<compile_context>
chip_gen: v7x
topology: tpu7x:2x2x1
jax: 0.10.0
libtpu: 0.0.40
codegen_flags: <defaults>
</compile_context>

<pallas_src>
import jax
import jax.numpy as jnp
from jax.experimental import pallas as pl
from jax.experimental.pallas import tpu as pltpu

BN_EPS = 1e-5


def _round_up(x, m):
    return ((x + m - 1) // m) * m


# ---------------------------------------------------------------------------
# The fused SAGN kernel (one node tile per grid step).
# ---------------------------------------------------------------------------
def make_sagn_kernel(num_hops, negative_slope):
    K = num_hops

    def kernel(*refs):
        feat_refs = refs[:K]
        (w1_ref, s1_ref, t1_ref, w2_ref, b2_ref,
         wlr_ref, summ_ref, bcast_ref, exp2_ref,
         meanbn_ref, wres_ref, bnshift_ref,
         wm1_ref, sm1_ref, tm1_ref, wm2_ref, bm2_ref) = refs[K:-1]
        out_ref = refs[-1]

        # ---- lane-concatenated features [T, K*Fin] (bf16 cast happens in VMEM, no HBM pre-pass)
        x = jnp.concatenate([r[...].astype(jnp.bfloat16) for r in feat_refs], axis=-1)

        # ---- all K per-hop 2-layer MLPs as two block-diagonal bf16 matmuls ----
        h1 = jnp.dot(x, w1_ref[...], preferred_element_type=jnp.float32)        # [T, K*D]
        h1 = jnp.maximum(h1 * s1_ref[...] + t1_ref[...], 0.0)                   # bias+BN+ReLU folded
        hid = jnp.dot(h1.astype(jnp.bfloat16), w2_ref[...],
                      preferred_element_type=jnp.float32) + b2_ref[...]         # [T, K*H*D]
        hid_b = hid.astype(jnp.bfloat16)

        # ---- hop-attention logits, lane-packed at columns [c0, c0+K*H) of the output slab ----
        z = jnp.dot(hid_b, wlr_ref[...], preferred_element_type=jnp.float32)    # [T, OUT_PAD]
        z = jnp.maximum(z, negative_slope * z)                                   # leaky ReLU
        m = jnp.max(z, axis=-1, keepdims=True)   # per-row shift (same for every head -> valid)
        e = jnp.exp(z - m)                                                       # single exp
        # per-head softmax denominator + broadcast back (tiny matmuls; kept f32 so the emitted
        # attention weights sum to 1 well within tolerance)
        denom = jnp.dot(e, summ_ref[...], preferred_element_type=jnp.float32)    # [T, H]
        inv = pl.reciprocal(denom, approx=False)
        invb = jnp.dot(inv, bcast_ref[...], preferred_element_type=jnp.float32)  # [T, OUT_PAD]
        a_norm = e * invb          # softmax weights at the attention columns, exact 0 elsewhere

        # ---- attention-weighted hop sum (+ residual); head-mean & BN scale fused in one matmul
        a_bcast = jnp.dot(a_norm.astype(jnp.bfloat16), exp2_ref[...],
                          preferred_element_type=jnp.float32).astype(jnp.bfloat16)  # [T, K*H*D]
        weighted = hid_b * a_bcast
        y = (jnp.dot(weighted, meanbn_ref[...], preferred_element_type=jnp.float32)
             + jnp.dot(x, wres_ref[...], preferred_element_type=jnp.float32))       # [T, D]
        y = jnp.maximum(y + bnshift_ref[...], 0.0)                                   # BN shift + ReLU

        # ---- final 2-layer MLP (bias+BN folded) ----
        h = jnp.dot(y.astype(jnp.bfloat16), wm1_ref[...], preferred_element_type=jnp.float32)
        h = jnp.maximum(h * sm1_ref[...] + tm1_ref[...], 0.0)
        o = jnp.dot(h.astype(jnp.bfloat16), wm2_ref[...],
                    preferred_element_type=jnp.float32) + bm2_ref[...]               # [T, OUT_PAD]

        # single merged lane-dense store: cols [0,out_feats) = logits, [c0,c0+K*H) = attention
        out_ref[...] = (o + a_norm).astype(out_ref.dtype)

    return kernel


# ---------------------------------------------------------------------------
# Parameter folding / packing + the single pallas_call wrapper.
# ---------------------------------------------------------------------------
def _fold_bn(bn, bias):
    """Fold eval-mode BatchNorm1d (+ preceding linear bias) into scale/shift [1, C]."""
    scale = bn["gamma"] / jnp.sqrt(bn["var"] + BN_EPS)
    shift = bias * scale + bn["beta"] - bn["mean"] * scale
    return scale, shift


def _block_diag(mats):
    k = len(mats)
    r, c = mats[0].shape
    out = jnp.zeros((k * r, k * c), jnp.float32)
    for i, m in enumerate(mats):
        out = out.at[i * r:(i + 1) * r, i * c:(i + 1) * c].set(m)
    return out


def _pick_tiling(n, requested=None):
    """Per-generation node-tile size and VMEM limit; guarantee >= 2 tiles (megacore / v7x)."""
    try:
        kind = jax.devices()[0].device_kind.lower()
    except Exception:
        kind = ""
    if "v7" in kind:
        tile_cap, vmem = 512, 32 * 1024 * 1024        # v7x: 64 MiB VMEM / TensorCore
    elif ("v5" in kind) or ("v6" in kind):
        tile_cap, vmem = 1024, 64 * 1024 * 1024       # v5e / v6e: 128 MiB VMEM
    else:
        tile_cap, vmem = 512, None                    # conservative default
    tile = requested if requested is not None else tile_cap
    tile = max(8, min(tile, _round_up(n, 8)))
    if n > 16 and pl.cdiv(n, tile) < 2:               # keep both TensorCores busy
        tile = _round_up(pl.cdiv(n, 2), 8)
    return tile, vmem


def sagn_forward(params, feats, num_heads, hidden_dim, negative_slope=0.2, tile_n=None):
    """feats: list of K arrays [N, in_feats] (f32). Returns (out [N, out_feats] f32,
    a [N, num_heads, 1, K] f32) — same shapes/semantics as the PyTorch SAGN in eval mode."""
    K = len(feats)
    n, in_feats = feats[0].shape
    H, D = num_heads, hidden_dim
    hd = H * D
    out_feats = params["mlp"]["w2"].shape[1]
    c0 = out_feats                                     # attention columns start here in the slab
    out_pad = _round_up(out_feats + K * H, 128)
    bf = jnp.bfloat16

    # ---- per-hop MLPs: block-diagonal fused weights (small-dim regime) ----
    w1_bd = _block_diag([p["w1"] for p in params["fcs"]]).astype(bf)            # [K*Fin, K*D]
    fold1 = [_fold_bn(p["bn1"], p["b1"]) for p in params["fcs"]]
    s1 = jnp.concatenate([s for s, _ in fold1], axis=-1)                        # [1, K*D]
    t1 = jnp.concatenate([t for _, t in fold1], axis=-1)                        # [1, K*D]
    w2_bd = _block_diag([p["w2"] for p in params["fcs"]]).astype(bf)            # [K*D, K*hd]
    b2 = jnp.concatenate([p["b2"] for p in params["fcs"]], axis=-1)             # [1, K*hd]

    # ---- packed hop-attention matrices (logit columns land directly in the output slab) ----
    attn_l, attn_r = params["attn_l"], params["attn_r"]                         # [H, D]
    wlr = jnp.zeros((K * hd, out_pad), jnp.float32)
    for k in range(K):
        for h in range(H):
            col = c0 + k * H + h
            wlr = wlr.at[k * hd + h * D:k * hd + (h + 1) * D, col].set(attn_l[h])
            wlr = wlr.at[h * D:(h + 1) * D, col].add(attn_r[h])   # a_r (hop 0) broadcast to all hops
    wlr = wlr.astype(bf)

    summ = jnp.zeros((out_pad, H), jnp.float32)          # per-head softmax sum over hops
    for k in range(K):
        for h in range(H):
            summ = summ.at[c0 + k * H + h, h].set(1.0)
    bcast = summ.T                                        # [H, out_pad] broadcast-back (0 at junk cols)

    exp2 = jnp.zeros((out_pad, K * hd), jnp.float32)      # attention col -> hidden-lane broadcast
    for k in range(K):
        for h in range(H):
            exp2 = exp2.at[c0 + k * H + h, k * hd + h * D:k * hd + (h + 1) * D].set(1.0)
    exp2 = exp2.astype(bf)

    # ---- head-mean + SAGN BatchNorm scale fused; residual projection pre-folded with it ----
    bn_scale, bn_shift = _fold_bn(params["bn"], jnp.zeros((1, D), jnp.float32))
    mean_bn = jnp.tile(jnp.eye(D, dtype=jnp.float32), (H, 1)) * (bn_scale / H)          # [hd, D]
    meanbn_k = (jnp.tile(jnp.eye(D, dtype=jnp.float32), (K * H, 1)) * (bn_scale / H)).astype(bf)
    wres_fold = jnp.zeros((K * in_feats, D), jnp.float32).at[:in_feats].set(
        params["res_w"] @ mean_bn).astype(bf)             # nonzero rows pick feats[0] only

    # ---- final MLP (output columns land at [0, out_feats) of the merged slab) ----
    sm1, tm1 = _fold_bn(params["mlp"]["bn1"], params["mlp"]["b1"])
    wm1 = params["mlp"]["w1"].astype(bf)
    wm2 = jnp.zeros((D, out_pad), jnp.float32).at[:, :out_feats].set(params["mlp"]["w2"]).astype(bf)
    bm2 = jnp.zeros((1, out_pad), jnp.float32).at[:, :out_feats].set(params["mlp"]["b2"])

    # ---- tiling / grid ----
    tile, vmem_limit = _pick_tiling(n, tile_n)
    num_tiles = pl.cdiv(n, tile)
    row_spec = lambda i: (i, 0)
    cst = lambda i: (0, 0)     # constant block index -> weights stay VMEM-resident across steps

    weights = (w1_bd, s1, t1, w2_bd, b2, wlr, summ, bcast, exp2,
               meanbn_k, wres_fold, bn_shift, wm1, sm1, tm1, wm2, bm2)
    in_specs = ([pl.BlockSpec((tile, in_feats), row_spec) for _ in range(K)] +
                [pl.BlockSpec(w.shape, cst) for w in weights])
    # TODO(synk): on v7x with production-sized hidden dims, single-buffer the constant-index
    # weight specs (pipeline_mode=pl.Buffered(1)) and/or stream hops with an online softmax.

    grid_spec = pltpu.PrefetchScalarGridSpec(
        num_scalar_prefetch=0,
        grid=(num_tiles,),
        in_specs=in_specs,
        out_specs=pl.BlockSpec((tile, out_pad), row_spec),
    )

    cp_kwargs = dict(dimension_semantics=("parallel",))
    if vmem_limit is not None:
        cp_kwargs["vmem_limit_bytes"] = vmem_limit

    merged = pl.pallas_call(
        make_sagn_kernel(K, negative_slope),
        out_shape=jax.ShapeDtypeStruct((n, out_pad), jnp.bfloat16),
        grid_spec=grid_spec,
        compiler_params=pltpu.CompilerParams(**cp_kwargs),
    )(*feats, *weights)

    out = merged[:, :out_feats].astype(jnp.float32)
    a = merged[:, c0:c0 + K * H].astype(jnp.float32).reshape(n, K, H)
    a = jnp.transpose(a, (0, 2, 1))[:, :, None, :]                   # [N, H, 1, K]
    return out, a


# ---------------------------------------------------------------------------
# Deterministic synthetic parameters (shapes mirror SAGN.__init__ with n_layers=2).
# ---------------------------------------------------------------------------
def bn_params(d):
    return dict(gamma=jnp.ones((1, d), jnp.float32),
                beta=jnp.zeros((1, d), jnp.float32),
                mean=jnp.zeros((1, d), jnp.float32),
                var=jnp.ones((1, d), jnp.float32))


def init_params(key, in_feats, hidden, out_feats, num_hops, num_heads):
    def normal(k, shape, scale=0.1):
        return scale * jax.random.normal(k, shape, dtype=jnp.float32)

    keys = iter(jax.random.split(key, 64))
    params = {}

    fcs = []
    for _ in range(num_hops):
        fcs.append(dict(
            w1=normal(next(keys), (in_feats, hidden)),
            b1=jnp.zeros((1, hidden), jnp.float32),
            bn1=bn_params(hidden),
            w2=normal(next(keys), (hidden, hidden * num_heads)),
            b2=jnp.zeros((1, hidden * num_heads), jnp.float32),
        ))
    params["fcs"] = fcs

    params["res_w"] = normal(next(keys), (in_feats, hidden * num_heads))  # res_fc: bias=False
    params["attn_l"] = normal(next(keys), (num_heads, hidden))
    params["attn_r"] = normal(next(keys), (num_heads, hidden))
    params["bn"] = bn_params(hidden)
    params["mlp"] = dict(
        w1=normal(next(keys), (hidden, hidden)),
        b1=jnp.zeros((1, hidden), jnp.float32),
        bn1=bn_params(hidden),
        w2=normal(next(keys), (hidden, out_feats)),
        b2=jnp.zeros((1, out_feats), jnp.float32),
    )
    return params


if __name__ == "__main__":
    N = 64
    IN_FEATS = 32
    HIDDEN = 32
    OUT_FEATS = 16
    LABEL_IN_FEATS = 8
    NUM_HOPS = 3
    NUM_HEADS = 2

    key = jax.random.PRNGKey(0)
    k_feats, k_label, k_params = jax.random.split(key, 3)

    feat_keys = jax.random.split(k_feats, NUM_HOPS)
    feats = [jax.random.normal(feat_keys[i], (N, IN_FEATS), dtype=jnp.float32)
             for i in range(NUM_HOPS)]
    label_emb = jax.random.normal(k_label, (N, LABEL_IN_FEATS), dtype=jnp.float32)  # unused (use_labels=False)

    params = init_params(k_params, IN_FEATS, HIDDEN, OUT_FEATS, NUM_HOPS, NUM_HEADS)

    # TODO(synk): use_labels=True branch (label_fc MLP on label_emb) not exercised here.
    out, a = sagn_forward(params, feats, NUM_HEADS, HIDDEN)
    jax.block_until_ready(out)
    jax.block_until_ready(a)

    assert out.shape == (N, OUT_FEATS), out.shape
    assert a.shape == (N, NUM_HEADS, 1, NUM_HOPS), a.shape
    assert bool(jnp.isfinite(out).all()) and bool(jnp.isfinite(a).all())
    # hop-attention weights must softmax to ~1 (bf16 output slab -> loose tol)
    assert bool(jnp.allclose(a.sum(axis=-1), 1.0, atol=1e-2))
    print("KERNEL_OK")
</pallas_src>

<mosaic_0001>
module attributes {stable_mosaic.version = 11 : i64} {
  func.func @kernel(%arg0: i32, %arg1: memref<32x32xf32, #tpu.memory_space<vmem>>, %arg2: memref<32x32xf32, #tpu.memory_space<vmem>>, %arg3: memref<32x32xf32, #tpu.memory_space<vmem>>, %arg4: memref<96x96xbf16, #tpu.memory_space<vmem>>, %arg5: memref<1x96xf32, #tpu.memory_space<vmem>>, %arg6: memref<1x96xf32, #tpu.memory_space<vmem>>, %arg7: memref<96x192xbf16, #tpu.memory_space<vmem>>, %arg8: memref<1x192xf32, #tpu.memory_space<vmem>>, %arg9: memref<192x128xbf16, #tpu.memory_space<vmem>>, %arg10: memref<128x2xf32, #tpu.memory_space<vmem>>, %arg11: memref<2x128xf32, #tpu.memory_space<vmem>>, %arg12: memref<128x192xbf16, #tpu.memory_space<vmem>>, %arg13: memref<192x32xbf16, #tpu.memory_space<vmem>>, %arg14: memref<96x32xbf16, #tpu.memory_space<vmem>>, %arg15: memref<1x32xf32, #tpu.memory_space<vmem>>, %arg16: memref<32x32xbf16, #tpu.memory_space<vmem>>, %arg17: memref<1x32xf32, #tpu.memory_space<vmem>>, %arg18: memref<1x32xf32, #tpu.memory_space<vmem>>, %arg19: memref<32x128xbf16, #tpu.memory_space<vmem>>, %arg20: memref<1x128xf32, #tpu.memory_space<vmem>>, %arg21: memref<32x128xbf16, #tpu.memory_space<vmem>>) attributes {dimension_semantics = [#tpu.dimension_semantics<parallel>], iteration_bounds = array<i64: 2>, scalar_prefetch = 0 : i64, scratch_operands = 0 : i64, tpu.core_type = #tpu.core_type<tc>, window_params = [{transform_indices = @transform_0, window_bounds = array<i64: 32, 32>}, {transform_indices = @transform_1, window_bounds = array<i64: 32, 32>}, {transform_indices = @transform_2, window_bounds = array<i64: 32, 32>}, {pipeline_mode = #tpu.pipeline_mode<synchronous>, transform_indices = @transform_3, window_bounds = array<i64: 96, 96>}, {pipeline_mode = #tpu.pipeline_mode<synchronous>, transform_indices = @transform_4, window_bounds = array<i64: 1, 96>}, {pipeline_mode = #tpu.pipeline_mode<synchronous>, transform_indices = @transform_5, window_bounds = array<i64: 1, 96>}, {pipeline_mode = #tpu.pipeline_mode<synchronous>, transform_indices = @transform_6, window_bounds = array<i64: 96, 192>}, {pipeline_mode = #tpu.pipeline_mode<synchronous>, transform_indices = @transform_7, window_bounds = array<i64: 1, 192>}, {pipeline_mode = #tpu.pipeline_mode<synchronous>, transform_indices = @transform_8, window_bounds = array<i64: 192, 128>}, {pipeline_mode = #tpu.pipeline_mode<synchronous>, transform_indices = @transform_9, window_bounds = array<i64: 128, 2>}, {pipeline_mode = #tpu.pipeline_mode<synchronous>, transform_indices = @transform_10, window_bounds = array<i64: 2, 128>}, {pipeline_mode = #tpu.pipeline_mode<synchronous>, transform_indices = @transform_11, window_bounds = array<i64: 128, 192>}, {pipeline_mode = #tpu.pipeline_mode<synchronous>, transform_indices = @transform_12, window_bounds = array<i64: 192, 32>}, {pipeline_mode = #tpu.pipeline_mode<synchronous>, transform_indices = @transform_13, window_bounds = array<i64: 96, 32>}, {pipeline_mode = #tpu.pipeline_mode<synchronous>, transform_indices = @transform_14, window_bounds = array<i64: 1, 32>}, {pipeline_mode = #tpu.pipeline_mode<synchronous>, transform_indices = @transform_15, window_bounds = array<i64: 32, 32>}, {pipeline_mode = #tpu.pipeline_mode<synchronous>, transform_indices = @transform_16, window_bounds = array<i64: 1, 32>}, {pipeline_mode = #tpu.pipeline_mode<synchronous>, transform_indices = @transform_17, window_bounds = array<i64: 1, 32>}, {pipeline_mode = #tpu.pipeline_mode<synchronous>, transform_indices = @transform_18, window_bounds = array<i64: 32, 128>}, {pipeline_mode = #tpu.pipeline_mode<synchronous>, transform_indices = @transform_19, window_bounds = array<i64: 1, 128>}, {transform_indices = @transform_20, window_bounds = array<i64: 32, 128>}]} {
    %c0 = arith.constant 0 : index
    %c0_0 = arith.constant 0 : index
    %0 = vector.load %arg1[%c0, %c0_0] : memref<32x32xf32, #tpu.memory_space<vmem>>, vector<32x32xf32>
    %1 = arith.truncf %0 : vector<32x32xf32> to vector<32x32xbf16>
    %c0_1 = arith.constant 0 : index
    %c0_2 = arith.constant 0 : index
    %2 = vector.load %arg2[%c0_1, %c0_2] : memref<32x32xf32, #tpu.memory_space<vmem>>, vector<32x32xf32>
    %3 = arith.truncf %2 : vector<32x32xf32> to vector<32x32xbf16>
    %c0_3 = arith.constant 0 : index
    %c0_4 = arith.constant 0 : index
    %4 = vector.load %arg3[%c0_3, %c0_4] : memref<32x32xf32, #tpu.memory_space<vmem>>, vector<32x32xf32>
    %5 = arith.truncf %4 : vector<32x32xf32> to vector<32x32xbf16>
    %6 = tpu.concatenate %1, %3, %5 in 1 : vector<32x32xbf16>, vector<32x32xbf16>, vector<32x32xbf16> -> vector<32x96xbf16>
    %c0_5 = arith.constant 0 : index
    %c0_6 = arith.constant 0 : index
    %7 = vector.load %arg4[%c0_5, %c0_6] : memref<96x96xbf16, #tpu.memory_space<vmem>>, vector<96x96xbf16>
    %cst = arith.constant dense<0.000000e+00> : vector<32x96xf32>
    %8 = tpu.matmul %6, %7, %cst {dimension_numbers = #tpu.dot_dimension_numbers<[1], [0], [0], [1], [0, 0, 1, 1], [], []>} : vector<32x96xbf16>, vector<96x96xbf16>, vector<32x96xf32> -> vector<32x96xf32>
    %c0_7 = arith.constant 0 : index
    %c0_8 = arith.constant 0 : index
    %9 = vector.load %arg5[%c0_7, %c0_8] : memref<1x96xf32, #tpu.memory_space<vmem>>, vector<1x96xf32>
    %10 = vector.broadcast %9 : vector<1x96xf32> to vector<32x96xf32>
    %11 = arith.mulf %8, %10 : vector<32x96xf32>
    %c0_9 = arith.constant 0 : index
    %c0_10 = arith.constant 0 : index
    %12 = vector.load %arg6[%c0_9, %c0_10] : memref<1x96xf32, #tpu.memory_space<vmem>>, vector<1x96xf32>
    %13 = vector.broadcast %12 : vector<1x96xf32> to vector<32x96xf32>
    %14 = arith.addf %11, %13 : vector<32x96xf32>
    %cst_11 = arith.constant 0.000000e+00 : f32
    %15 = vector.broadcast %cst_11 : f32 to vector<32x96xf32>
    %16 = arith.maximumf %14, %15 : vector<32x96xf32>
    %17 = arith.truncf %16 : vector<32x96xf32> to vector<32x96xbf16>
    %c0_12 = arith.constant 0 : index
    %c0_13 = arith.constant 0 : index
    %18 = vector.load %arg7[%c0_12, %c0_13] : memref<96x192xbf16, #tpu.memory_space<vmem>>, vector<96x192xbf16>
    %cst_14 = arith.constant dense<0.000000e+00> : vector<32x192xf32>
    %19 = tpu.matmul %17, %18, %cst_14 {dimension_numbers = #tpu.dot_dimension_numbers<[1], [0], [0], [1], [0, 0, 1, 1], [], []>} : vector<32x96xbf16>, vector<96x192xbf16>, vector<32x192xf32> -> vector<32x192xf32>
    %c0_15 = arith.constant 0 : index
    %c0_16 = arith.constant 0 : index
    %20 = vector.load %arg8[%c0_15, %c0_16] : memref<1x192xf32, #tpu.memory_space<vmem>>, vector<1x192xf32>
    %21 = vector.broadcast %20 : vector<1x192xf32> to vector<32x192xf32>
    %22 = arith.addf %19, %21 : vector<32x192xf32>
    %23 = arith.truncf %22 : vector<32x192xf32> to vector<32x192xbf16>
    %c0_17 = arith.constant 0 : index
    %c0_18 = arith.constant 0 : index
    %24 = vector.load %arg9[%c0_17, %c0_18] : memref<192x128xbf16, #tpu.memory_space<vmem>>, vector<192x128xbf16>
    %cst_19 = arith.constant dense<0.000000e+00> : vector<32x128xf32>
    %25 = tpu.matmul %23, %24, %cst_19 {dimension_numbers = #tpu.dot_dimension_numbers<[1], [0], [0], [1], [0, 0, 1, 1], [], []>} : vector<32x192xbf16>, vector<192x128xbf16>, vector<32x128xf32> -> vector<32x128xf32>
    %cst_20 = arith.constant 2.000000e-01 : f32
    %26 = vector.broadcast %cst_20 : f32 to vector<32x128xf32>
    %27 = arith.mulf %26, %25 : vector<32x128xf32>
    %28 = arith.maximumf %25, %27 : vector<32x128xf32>
    %cst_21 = arith.constant dense<0xFF800000> : vector<32xf32>
    %29 = vector.multi_reduction <maximumf>, %28, %cst_21 [1] : vector<32x128xf32> to vector<32xf32>
    %30 = vector.shape_cast %29 : vector<32xf32> to vector<32x1xf32>
    %31 = vector.broadcast %30 : vector<32x1xf32> to vector<32x128xf32>
    %32 = arith.subf %28, %31 : vector<32x128xf32>
    %33 = math.exp %32 : vector<32x128xf32>
    %c0_22 = arith.constant 0 : index
    %c0_23 = arith.constant 0 : index
    %34 = vector.load %arg10[%c0_22, %c0_23] : memref<128x2xf32, #tpu.memory_space<vmem>>, vector<128x2xf32>
    %cst_24 = arith.constant dense<0.000000e+00> : vector<32x2xf32>
    %35 = tpu.matmul %33, %34, %cst_24 {dimension_numbers = #tpu.dot_dimension_numbers<[1], [0], [0], [1], [0, 0, 1, 1], [], []>} : vector<32x128xf32>, vector<128x2xf32>, vector<32x2xf32> -> vector<32x2xf32>
    %36 = tpu.reciprocal %35 : vector<32x2xf32> -> vector<32x2xf32>
    %c0_25 = arith.constant 0 : index
    %c0_26 = arith.constant 0 : index
    %37 = vector.load %arg11[%c0_25, %c0_26] : memref<2x128xf32, #tpu.memory_space<vmem>>, vector<2x128xf32>
    %cst_27 = arith.constant dense<0.000000e+00> : vector<32x128xf32>
    %38 = tpu.matmul %36, %37, %cst_27 {dimension_numbers = #tpu.dot_dimension_numbers<[1], [0], [0], [1], [0, 0, 1, 1], [], []>} : vector<32x2xf32>, vector<2x128xf32>, vector<32x128xf32> -> vector<32x128xf32>
    %39 = arith.mulf %33, %38 : vector<32x128xf32>
    %40 = arith.truncf %39 : vector<32x128xf32> to vector<32x128xbf16>
    %c0_28 = arith.constant 0 : index
    %c0_29 = arith.constant 0 : index
    %41 = vector.load %arg12[%c0_28, %c0_29] : memref<128x192xbf16, #tpu.memory_space<vmem>>, vector<128x192xbf16>
    %cst_30 = arith.constant dense<0.000000e+00> : vector<32x192xf32>
    %42 = tpu.matmul %40, %41, %cst_30 {dimension_numbers = #tpu.dot_dimension_numbers<[1], [0], [0], [1], [0, 0, 1, 1], [], []>} : vector<32x128xbf16>, vector<128x192xbf16>, vector<32x192xf32> -> vector<32x192xf32>
    %43 = arith.truncf %42 : vector<32x192xf32> to vector<32x192xbf16>
    %44 = arith.mulf %23, %43 : vector<32x192xbf16>
    %c0_31 = arith.constant 0 : index
    %c0_32 = arith.constant 0 : index
    %45 = vector.load %arg13[%c0_31, %c0_32] : memref<192x32xbf16, #tpu.memory_space<vmem>>, vector<192x32xbf16>
    %cst_33 = arith.constant dense<0.000000e+00> : vector<32x32xf32>
    %46 = tpu.matmul %44, %45, %cst_33 {dimension_numbers = #tpu.dot_dimension_numbers<[1], [0], [0], [1], [0, 0, 1, 1], [], []>} : vector<32x192xbf16>, vector<192x32xbf16>, vector<32x32xf32> -> vector<32x32xf32>
    %c0_34 = arith.constant 0 : index
    %c0_35 = arith.constant 0 : index
    %47 = vector.load %arg14[%c0_34, %c0_35] : memref<96x32xbf16, #tpu.memory_space<vmem>>, vector<96x32xbf16>
    %cst_36 = arith.constant dense<0.000000e+00> : vector<32x32xf32>
    %48 = tpu.matmul %6, %47, %cst_36 {dimension_numbers = #tpu.dot_dimension_numbers<[1], [0], [0], [1], [0, 0, 1, 1], [], []>} : vector<32x96xbf16>, vector<96x32xbf16>, vector<32x32xf32> -> vector<32x32xf32>
    %49 = arith.addf %46, %48 : vector<32x32xf32>
    %c0_37 = arith.constant 0 : index
    %c0_38 = arith.constant 0 : index
    %50 = vector.load %arg15[%c0_37, %c0_38] : memref<1x32xf32, #tpu.memory_space<vmem>>, vector<1x32xf32>
    %51 = vector.broadcast %50 : vector<1x32xf32> to vector<32x32xf32>
    %52 = arith.addf %49, %51 : vector<32x32xf32>
    %cst_39 = arith.constant 0.000000e+00 : f32
    %53 = vector.broadcast %cst_39 : f32 to vector<32x32xf32>
    %54 = arith.maximumf %52, %53 : vector<32x32xf32>
    %55 = arith.truncf %54 : vector<32x32xf32> to vector<32x32xbf16>
    %c0_40 = arith.constant 0 : index
    %c0_41 = arith.constant 0 : index
    %56 = vector.load %arg16[%c0_40, %c0_41] : memref<32x32xbf16, #tpu.memory_space<vmem>>, vector<32x32xbf16>
    %cst_42 = arith.constant dense<0.000000e+00> : vector<32x32xf32>
    %57 = tpu.matmul %55, %56, %cst_42 {dimension_numbers = #tpu.dot_dimension_numbers<[1], [0], [0], [1], [0, 0, 1, 1], [], []>} : vector<32x32xbf16>, vector<32x32xbf16>, vector<32x32xf32> -> vector<32x32xf32>
    %c0_43 = arith.constant 0 : index
    %c0_44 = arith.constant 0 : index
    %58 = vector.load %arg17[%c0_43, %c0_44] : memref<1x32xf32, #tpu.memory_space<vmem>>, vector<1x32xf32>
    %59 = vector.broadcast %58 : vector<1x32xf32> to vector<32x32xf32>
    %60 = arith.mulf %57, %59 : vector<32x32xf32>
    %c0_45 = arith.constant 0 : index
    %c0_46 = arith.constant 0 : index
    %61 = vector.load %arg18[%c0_45, %c0_46] : memref<1x32xf32, #tpu.memory_space<vmem>>, vector<1x32xf32>
    %62 = vector.broadcast %61 : vector<1x32xf32> to vector<32x32xf32>
    %63 = arith.addf %60, %62 : vector<32x32xf32>
    %cst_47 = arith.constant 0.000000e+00 : f32
    %64 = vector.broadcast %cst_47 : f32 to vector<32x32xf32>
    %65 = arith.maximumf %63, %64 : vector<32x32xf32>
    %66 = arith.truncf %65 : vector<32x32xf32> to vector<32x32xbf16>
    %c0_48 = arith.constant 0 : index
    %c0_49 = arith.constant 0 : index
    %67 = vector.load %arg19[%c0_48, %c0_49] : memref<32x128xbf16, #tpu.memory_space<vmem>>, vector<32x128xbf16>
    %cst_50 = arith.constant dense<0.000000e+00> : vector<32x128xf32>
    %68 = tpu.matmul %66, %67, %cst_50 {dimension_numbers = #tpu.dot_dimension_numbers<[1], [0], [0], [1], [0, 0, 1, 1], [], []>} : vector<32x32xbf16>, vector<32x128xbf16>, vector<32x128xf32> -> vector<32x128xf32>
    %c0_51 = arith.constant 0 : index
    %c0_52 = arith.constant 0 : index
    %69 = vector.load %arg20[%c0_51, %c0_52] : memref<1x128xf32, #tpu.memory_space<vmem>>, vector<1x128xf32>
    %70 = vector.broadcast %69 : vector<1x128xf32> to vector<32x128xf32>
    %71 = arith.addf %68, %70 : vector<32x128xf32>
    %72 = arith.addf %71, %39 : vector<32x128xf32>
    %73 = arith.truncf %72 : vector<32x128xf32> to vector<32x128xbf16>
    %c0_53 = arith.constant 0 : index
    %c0_54 = arith.constant 0 : index
    %74 = vector.load %arg21[%c0_53, %c0_54] : memref<32x128xbf16, #tpu.memory_space<vmem>>, vector<32x128xbf16>
    tpu.vector_store %arg21[%c0_53, %c0_54], %73 {strides = array<i32>} : memref<32x128xbf16, #tpu.memory_space<vmem>>, vector<32x128xbf16>,
    return
  }
  func.func @transform_0(%arg0: i32) -> (i32, i32) {
    %c0_i32 = arith.constant 0 : i32
    %c0_i32_0 = arith.constant 0 : i32
    return %arg0, %c0_i32 : i32, i32
  }
  func.func @transform_1(%arg0: i32) -> (i32, i32) {
    %c0_i32 = arith.constant 0 : i32
    %c0_i32_0 = arith.constant 0 : i32
    return %arg0, %c0_i32 : i32, i32
  }
  func.func @transform_2(%arg0: i32) -> (i32, i32) {
    %c0_i32 = arith.constant 0 : i32
    %c0_i32_0 = arith.constant 0 : i32
    return %arg0, %c0_i32 : i32, i32
  }
  func.func @transform_3(%arg0: i32) -> (i32, i32) {
    %c0_i32 = arith.constant 0 : i32
    %c0_i32_0 = arith.constant 0 : i32
    %c0_i32_1 = arith.constant 0 : i32
    return %c0_i32, %c0_i32_0 : i32, i32
  }
  func.func @transform_4(%arg0: i32) -> (i32, i32) {
    %c0_i32 = arith.constant 0 : i32
    %c0_i32_0 = arith.constant 0 : i32
    %c0_i32_1 = arith.constant 0 : i32
    return %c0_i32, %c0_i32_0 : i32, i32
  }
  func.func @transform_5(%arg0: i32) -> (i32, i32) {
    %c0_i32 = arith.constant 0 : i32
    %c0_i32_0 = arith.constant 0 : i32
    %c0_i32_1 = arith.constant 0 : i32
    return %c0_i32, %c0_i32_0 : i32, i32
  }
  func.func @transform_6(%arg0: i32) -> (i32, i32) {
    %c0_i32 = arith.constant 0 : i32
    %c0_i32_0 = arith.constant 0 : i32
    %c0_i32_1 = arith.constant 0 : i32
    return %c0_i32, %c0_i32_0 : i32, i32
  }
  func.func @transform_7(%arg0: i32) -> (i32, i32) {
    %c0_i32 = arith.constant 0 : i32
    %c0_i32_0 = arith.constant 0 : i32
    %c0_i32_1 = arith.constant 0 : i32
    return %c0_i32, %c0_i32_0 : i32, i32
  }
  func.func @transform_8(%arg0: i32) -> (i32, i32) {
    %c0_i32 = arith.constant 0 : i32
    %c0_i32_0 = arith.constant 0 : i32
    %c0_i32_1 = arith.constant 0 : i32
    return %c0_i32, %c0_i32_0 : i32, i32
  }
  func.func @transform_9(%arg0: i32) -> (i32, i32) {
    %c0_i32 = arith.constant 0 : i32
    %c0_i32_0 = arith.constant 0 : i32
    %c0_i32_1 = arith.constant 0 : i32
    return %c0_i32, %c0_i32_0 : i32, i32
  }
  func.func @transform_10(%arg0: i32) -> (i32, i32) {
    %c0_i32 = arith.constant 0 : i32
    %c0_i32_0 = arith.constant 0 : i32
    %c0_i32_1 = arith.constant 0 : i32
    return %c0_i32, %c0_i32_0 : i32, i32
  }
  func.func @transform_11(%arg0: i32) -> (i32, i32) {
    %c0_i32 = arith.constant 0 : i32
    %c0_i32_0 = arith.constant 0 : i32
    %c0_i32_1 = arith.constant 0 : i32
    return %c0_i32, %c0_i32_0 : i32, i32
  }
  func.func @transform_12(%arg0: i32) -> (i32, i32) {
    %c0_i32 = arith.constant 0 : i32
    %c0_i32_0 = arith.constant 0 : i32
    %c0_i32_1 = arith.constant 0 : i32
    return %c0_i32, %c0_i32_0 : i32, i32
  }
  func.func @transform_13(%arg0: i32) -> (i32, i32) {
    %c0_i32 = arith.constant 0 : i32
    %c0_i32_0 = arith.constant 0 : i32
    %c0_i32_1 = arith.constant 0 : i32
    return %c0_i32, %c0_i32_0 : i32, i32
  }
  func.func @transform_14(%arg0: i32) -> (i32, i32) {
    %c0_i32 = arith.constant 0 : i32
    %c0_i32_0 = arith.constant 0 : i32
    %c0_i32_1 = arith.constant 0 : i32
    return %c0_i32, %c0_i32_0 : i32, i32
  }
  func.func @transform_15(%arg0: i32) -> (i32, i32) {
    %c0_i32 = arith.constant 0 : i32
    %c0_i32_0 = arith.constant 0 : i32
    %c0_i32_1 = arith.constant 0 : i32
    return %c0_i32, %c0_i32_0 : i32, i32
  }
  func.func @transform_16(%arg0: i32) -> (i32, i32) {
    %c0_i32 = arith.constant 0 : i32
    %c0_i32_0 = arith.constant 0 : i32
    %c0_i32_1 = arith.constant 0 : i32
    return %c0_i32, %c0_i32_0 : i32, i32
  }
  func.func @transform_17(%arg0: i32) -> (i32, i32) {
    %c0_i32 = arith.constant 0 : i32
    %c0_i32_0 = arith.constant 0 : i32
    %c0_i32_1 = arith.constant 0 : i32
    return %c0_i32, %c0_i32_0 : i32, i32
  }
  func.func @transform_18(%arg0: i32) -> (i32, i32) {
    %c0_i32 = arith.constant 0 : i32
    %c0_i32_0 = arith.constant 0 : i32
    %c0_i32_1 = arith.constant 0 : i32
    return %c0_i32, %c0_i32_0 : i32, i32
  }
  func.func @transform_19(%arg0: i32) -> (i32, i32) {
    %c0_i32 = arith.constant 0 : i32
    %c0_i32_0 = arith.constant 0 : i32
    %c0_i32_1 = arith.constant 0 : i32
    return %c0_i32, %c0_i32_0 : i32, i32
  }
  func.func @transform_20(%arg0: i32) -> (i32, i32) {
    %c0_i32 = arith.constant 0 : i32
    %c0_i32_0 = arith.constant 0 : i32
    return %arg0, %c0_i32 : i32, i32
  }
}

</mosaic_0001>

<bundles_post_ra>
// kernel: tpu_custom_call.1
= control target key start
LH: loop header
LB: loop body
LE: loop exit
PB: predicated region body
PF: predicated region fallthrough
CT: control target
= control target key end

     0   :  { %s3229_s0 = inlined_call_operand.vmem [shape: f32[64,32], index: 0, kind: input, shape index: {}]   ;;  %s3230_s1 = inlined_call_operand.vmem [shape: f32[64,32], index: 1, kind: input, shape index: {}]   ;;  %s3231_s2 = inlined_call_operand.vmem [shape: f32[64,32], index: 2, kind: input, shape index: {}]   ;;  %s3232_s3 = inlined_call_operand.vmem [shape: bf16[96,96], index: 3, kind: input, shape index: {}]   ;;  %s3233_s4 = inlined_call_operand.vmem [shape: f32[1,96], index: 4, kind: input, shape index: {}]   ;;  %s3234_s5 = inlined_call_operand.vmem [shape: f32[1,96], index: 5, kind: input, shape index: {}]   ;;  %s3235_s6 = inlined_call_operand.vmem [shape: bf16[96,192], index: 6, kind: input, shape index: {}]   ;;  %s3236_s7 = inlined_call_operand.vmem [shape: f32[1,192], index: 7, kind: input, shape index: {}]   ;;  %s3237_s8 = inlined_call_operand.vmem [shape: bf16[192,128], index: 8, kind: input, shape index: {}]   ;;  %s3238_s9 = inlined_call_operand.vmem [shape: f32[128,2], index: 9, kind: input, shape index: {}]   ;;  %s3239_s10 = inlined_call_operand.vmem [shape: f32[2,128], index: 10, kind: input, shape index: {}]   ;;  %s3240_s11 = inlined_call_operand.vmem [shape: bf16[128,192], index: 11, kind: input, shape index: {}]   ;;  %s3241_s12 = inlined_call_operand.vmem [shape: bf16[192,32], index: 12, kind: input, shape index: {}]   ;;  %s3242_s13 = inlined_call_operand.vmem [shape: bf16[96,32], index: 13, kind: input, shape index: {}]   ;;  %s3243_s14 = inlined_call_operand.vmem [shape: f32[1,32], index: 14, kind: input, shape index: {}]   ;;  %s3244_s15 = inlined_call_operand.vmem [shape: bf16[32,32], index: 15, kind: input, shape index: {}]   ;;  %s3245_s16 = inlined_call_operand.vmem [shape: f32[1,32], index: 16, kind: input, shape index: {}]   ;;  %s3246_s17 = inlined_call_operand.vmem [shape: f32[1,32], index: 17, kind: input, shape index: {}]   ;;  %s3247_s18 = inlined_call_operand.vmem [shape: bf16[32,128], index: 18, kind: input, shape index: {}]   ;;  %s3248_s19 = inlined_call_operand.vmem [shape: f32[1,128], index: 19, kind: input, shape index: {}]   ;;  %s3249_s20 = inlined_call_operand.hbm [shape: bf16[64,128], index: 20, kind: output, shape index: {}]  }
   0x1   :  { %3260 = sst [smem:[#allocation11_spill]] %s3229_s0 }
   0x2   :  { %3261 = sst [smem:[#allocation12_spill]] %s3230_s1 }
   0x3   :  { %3262 = sst [smem:[#allocation13_spill]] %s3231_s2 }
   0x4   :  { %3263 = sst [smem:[#allocation14_spill]] %s3232_s3 }
   0x5   :  { %3264 = sst [smem:[#allocation15_spill]] %s3233_s4 }
   0x6   :  { %3265 = sst [smem:[#allocation16_spill]] %s3234_s5 }
   0x7   :  { %3266 = sst [smem:[#allocation17_spill]] %s3249_s20 }
   0x8   :  { %25 = vsyncpa [#allocation3], 0 }
   0x9   :  { %27 = vsyncpa [#allocation3 + $0x1], 0  ;;  %s2730_s1 = smov 0   ;;  %s2732_s22 = smov 0  }
   0xa   :  { %s2734_s23 = smov 0   ;;  %s2736_s24 = smov 0  }
   0xb LB: > { %3267 = sst [smem:[#allocation5_spill]] %s2606_s1  ;;  %s2751_s2 = sadd.s32 4294967295, %s2618_s24   ;;  %s2618_s24 = sphi %s2736_s24, %s3286_s24   ;;  %s2614_s23 = sphi %s2734_s23, %s3288_s23   ;;  %s2610_s22 = sphi %s2732_s22, %s3290_s22   ;;  %s2606_s1 = sphi %s2730_s1, %s3289_s1  }
   0xc   : > { %3268 = sst [smem:[#allocation6_spill]] %s2614_s23  ;;  %s2111_s25 = sadd.s32 4294967294, %s2618_s24  }
   0xd   : > { %3269 = sst [smem:[#allocation7_spill]] %s2618_s24  ;;  %s2755_s3 = sadd.s32 1, %s2618_s24  }
   0xe   : > { %3270 = sst [smem:[#allocation8_spill]] %s2755_s3  ;;  %s475_s26 = sadd.s32 1, %s2614_s23 }
   0xf   : > { %s472_s27 = ssub.s32 %s2618_s24, %s2755_s3  ;;  %p485_p0 = scmp.ne.s32.totalorder %s2614_s23, %s2610_s22 }
  0x10   : > { %p473_p1 = scmp.eq.s32.totalorder %s472_s27, 0  ;;  %p486_p2 = scmp.eq.s32.totalorder %s2751_s2, 1 }
  0x11   : > { %p491_p3 = scmp.ne.s32.totalorder %s2610_s22, %s2606_s1  ;;  %p492_p4 = scmp.eq.s32.totalorder %s2111_s25, 1 }
  0x12   : > { %s2766_s28 = scalar_select %p473_p1, %s2614_s23, %s475_s26  }
  0x13   : > { %p2768_p5 = por %p486_p2, %p485_p0  ;;  %p2772_p6 = por %p492_p4, %p491_p3 }
  0x14   : > { %3271 = sst [smem:[#allocation9_spill]] %s2766_s28  ;;  %p2114_p7 = scmp.ge.s32.totalorder %s2618_s24, 1 }
  0x15   : > { %s3273_s29 = scalar_select %p2772_p6, 1, 0 }
  0x16   : > { %p588_p8 = scmp.lt.s32.totalorder %s2618_s24, 3 }
  0x17   : > { %3274 = sst [smem:[#allocation10_spill]] %s3273_s29 }
  0x18   : > { %p589_p9 = pnand %p2114_p7, %p588_p8 }
  0x19   : > { %s2116_s30 = sshll.u32 (!%p589_p9), %s2751_s2, 2  ;;  %s3275_s25 = sld [smem:[#allocation14_spill]] (!%p589_p9)  ;;  %v2464_v16 = vld [vmem:[%s3235_s6 + $0x4] ss:$8 sps:$4 sm:$0xff] (!%p589_p9)   ;;  %v2466_v17 = vld [vmem:[%s3235_s6] ss:$8 sps:$4 sm:$0xff] (!%p589_p9)  }
  0x1a   : > { %592 = sbr.rel (%p589_p9) target bundleno = 2332 (0x91c), region = 100  ;;  %p657_p10 = scmp.lt.s32.totalorder (!%p589_p9), %s2116_s30, 7  ;;  %v2467_v19 = vld [vmem:[%s3235_s6 + $0x14] ss:$8 sps:$4 sm:$0xff] (!%p589_p9)   ;;  %938 = vmatprep.subr.bf16.mxu1 (!%p589_p9), %v2464_v16  ;;  %v2469_v20 = vld [vmem:[%s3235_s6 + $0x10] ss:$8 sps:$4 sm:$0xff] (!%p589_p9)  }
  0x1b   : > { %s3276_s0 = sld [smem:[#allocation12_spill]] (!%p589_p9)  ;;  %s3277_s24 = sld [smem:[#allocation13_spill]] (!%p589_p9)  ;;  %939 = vmatpush1.bf16.msra.mxu1 (!%p589_p9), %v2466_v17  ;;  %v2470_v21 = vld [vmem:[%s3235_s6 + $0x24] ss:$8 sps:$4 sm:$0xff] (!%p589_p9)   ;;  %v2472_v23 = vld [vmem:[%s3235_s6 + $0x20] ss:$8 sps:$4 sm:$0xff] (!%p589_p9)  }
  0x1c   : > { %s2620_s1 = smov (!%p589_p9), 32   ;;  %s3258_s29 = smov (!%p589_p9), 64   ;;  %940 = vmatprep.subr.bf16.mxu1 (!%p589_p9), %v2467_v19  ;;  %vm706_vm0 = vcmask (!%p589_p9), 261120   ;;  %vm713_vm1 = vcmask (!%p589_p9), 523264   ;;  %vm766_vm2 = vcmask (!%p589_p9), 785408   ;;  %v2622_v44 = vmov (!%p589_p9), 0  }
  0x1d   : > { %s3279_s23 = sld [smem:[#allocation11_spill]] (!%p589_p9)  ;;  %v2473_v38 = vld [vmem:[%s3235_s6 + $0x34] ss:$8 sps:$4 sm:$0xff] (!%p589_p9)   ;;  %v2475_v39 = vld [vmem:[%s3235_s6 + $0x30] ss:$8 sps:$4 sm:$0xff] (!%p589_p9)   ;;  %970 = vmatprep.mubr.bf16.mxu1 (!%p589_p9), %v2622_v44  ;;  %v2482_v45 = vld [vmem:[%s3237_s8] sm:$0xff] (!%p589_p9)  }
  0x1e   : > { %v2476_v40 = vld [vmem:[%s3235_s6 + $0x44] ss:$8 sps:$4 sm:$0xff] (!%p589_p9)   ;;  %v2478_v41 = vld [vmem:[%s3235_s6 + $0x40] ss:$8 sps:$4 sm:$0xff] (!%p589_p9)   ;;  %v2479_v42 = vld [vmem:[%s3235_s6 + $0x54] ss:$8 sps:$4 sm:$0xff] (!%p589_p9)  }
  0x1f   : > { %v2458_v0 = vld [vmem:[%s3275_s25] sm:$0xff] (!%p589_p9)   ;;  %v2459_v1 = vld [vmem:[%s3275_s25 + $0x8] sm:$0xff] (!%p589_p9)   ;;  %v2460_v2 = vld [vmem:[%s3275_s25 + $0x10] sm:$0xff] (!%p589_p9)   ;;  %941 = vmatpush1.bf16.msra.mxu1 (!%p589_p9), %v2469_v20  ;;  %s3281_s5 = sld [smem:[#allocation16_spill]] (!%p589_p9)  ;;  %vm1293_vm3 = vcmask (!%p589_p9), 1041408   ;;  %vm1280_vm4 = vcmask (!%p589_p9), 15360  }
  0x20   : > { %2289 = vmatprep.subr.bf16.mxu0 (!%p589_p9), %v2458_v0  ;;  %v2461_v13 = vld [vmem:[%s3275_s25 + $0x18] sm:$0xff] (!%p589_p9)   ;;  %v2462_v18 = vld [vmem:[%s3275_s25 + $0x20] sm:$0xff] (!%p589_p9)   ;;  %v2463_v22 = vld [vmem:[%s3275_s25 + $0x28] sm:$0xff] (!%p589_p9)   ;;  %942 = vmatprep.subr.bf16.mxu1 (!%p589_p9), %v2470_v21  ;;  %s653_s26 = sand.u32 (!%p589_p9), 1, %s2610_s22  }
  0x21   : > { %s3292_s30 = smov (!%p657_p10, %s2116_s30), 7  ;;  %2290 = vmatpush3.bf16.msra.mxu0 %v2458_v0  ;;  %v2481_v43 = vld [vmem:[%s3235_s6 + $0x50] ss:$8 sps:$4 sm:$0xff]   ;;  %v2483_v46 = vld [vmem:[%s3237_s8 + $0x8] sm:$0xff]   ;;  %v2486_v49 = vld [vmem:[%s3237_s8 + $0x20] sm:$0xff]   ;;  %s3186_s27 = scalar_lea.sflag [#allocation3], %s653_s26 }
  0x22   : > { %s2785_s28 = sshll.u32 %s3292_s30, 3  ;;  %2291 = vmatprep.subr.bf16.mxu0 %v2459_v1  ;;  %v2484_v47 = vld [vmem:[%s3237_s8 + $0x10] sm:$0xff]   ;;  %v2485_v48 = vld [vmem:[%s3237_s8 + $0x18] sm:$0xff]   ;;  %v2487_v50 = vld [vmem:[%s3237_s8 + $0x28] sm:$0xff]  }
  0x23   : > { %s666_s21 = scalar_lea.vmem %s3276_s0, %s2785_s28  ;;  %s672_s20 = scalar_lea.vmem %s3277_s24, %s2785_s28  ;;  %943 = vmatpush1.bf16.msra.mxu1 %v2472_v23  ;;  %v2488_v51 = vld [vmem:[%s3237_s8 + $0x30] sm:$0xff]   ;;  %v2489_v52 = vld [vmem:[%s3237_s8 + $0x38] sm:$0xff]   ;;  %v2490_v53 = vld [vmem:[%s3237_s8 + $0x40] sm:$0xff]  }
  0x24   : > { %v682_v3 = vld [vmem:[%s666_s21] sm:$0xff]  ;;  %v683_v4 = vld [vmem:[%s666_s21 + $0x8] sm:$0xff]  ;;  %v684_v5 = vld [vmem:[%s666_s21 + $0x10] sm:$0xff]  ;;  %s3278_s0 = smov 64   ;;  %s660_s3 = scalar_lea.vmem %s3279_s23, %s2785_s28  ;;  %944 = vmatprep.subr.bf16.mxu1 %v2473_v38 }
  0x25   : > { %v686_v6 = vpack.c.bf16 %v683_v4, %v682_v3  ;;  %v688_v7 = vld [vmem:[%s672_s20] sm:$0xff]  ;;  %v689_v8 = vld [vmem:[%s672_s20 + $0x8] sm:$0xff]  ;;  %v685_v9 = vld [vmem:[%s666_s21 + $0x18] sm:$0xff]  ;;  %2292 = vmatpush3.bf16.msra.mxu0 %v2459_v1  ;;  %s3280_s24 = sld [smem:[#allocation15_spill]]  ;;  %s2228_s28 = sshll.u32 %s2751_s2, 8 }
  0x26   : > { %v692_v10 = vpack.c.bf16 %v689_v8, %v688_v7  ;;  %v690_v11 = vld [vmem:[%s672_s20 + $0x10] sm:$0xff]  ;;  %v691_v12 = vld [vmem:[%s672_s20 + $0x18] sm:$0xff]  ;;  %2293 = vmatprep.subr.bf16.mxu0 %v2460_v2  ;;  %v687_v14 = vpack.c.bf16 %v685_v9, %v684_v5  ;;  %v676_v24 = vld [vmem:[%s660_s3] sm:$0xff]  ;;  %s3282_s21 = sld [smem:[#allocation17_spill]] }
  0x27   : > { %696 = vrot.lane.b32.xlu0 %v686_v6, %s2620_s1  ;;  %v693_v15 = vpack.c.bf16 %v691_v12, %v690_v11  ;;  %v677_v25 = vld [vmem:[%s660_s3 + $0x8] sm:$0xff]  ;;  %v678_v27 = vld [vmem:[%s660_s3 + $0x10] sm:$0xff]  ;;  %v679_v28 = vld [vmem:[%s660_s3 + $0x18] sm:$0xff]  ;;  %945 = vmatpush1.bf16.msra.mxu1 %v2475_v39 }
  0x28   : > { %702 = vrot.lane.b32.xlu1 %v692_v10, %s3258_s29  ;;  %v680_v26 = vpack.c.bf16 %v677_v25, %v676_v24  ;;  %v681_v32 = vpack.c.bf16 %v679_v28, %v678_v27  ;;  %946 = vmatprep.subr.bf16.mxu1 %v2476_v40  ;;  %v2491_v54 = vld [vmem:[%s3237_s8 + $0x48] sm:$0xff]   ;;  %v2131_v57 = vld [vmem:[%s3281_s5] ss:$0 sm:$0xff]  ;;  %v2492_v11 = vld [vmem:[%s3237_s8 + $0x50] sm:$0xff]   ;;  %s2115_s29 = sshll.u32 %s653_s26, 4 }
  0x29   : > { %2294 = vmatpush3.bf16.msra.mxu0 %v2460_v2  ;;  %v2493_v12 = vld [vmem:[%s3237_s8 + $0x58] sm:$0xff]   ;;  %v860_v16 = vld [vmem:[%s3236_s7] sm:$0x3]  ;;  %s655_s23 = scalar_lea.vmem [#allocation2], %s2115_s29 }
  0x2a   : > { %2295 = vmatprep.subr.bf16.mxu0 %v2461_v13  ;;  %s2025_s3 = sshll.u32 %s655_s23, 4  ;;  %s3179_s3 = int_to_ptr.vmem [resolvable:$true] %s2025_s3 }
  0x2b   : > { %698 = vrot.lane.b32.xlu0 %v687_v14, %s2620_s1  ;;  %947 = vmatpush1.bf16.msra.mxu1 %v2478_v41  ;;  %v2130_v55 = vld [vmem:[%s3280_s24] ss:$0 sm:$0xff]  ;;  %s2556_s2 = scalar_lea.vmem %s3179_s3, 256  ;;  %s2623_s1 = smov [#allocation2]  }
  0x2c   : > { %704 = vrot.lane.b32.xlu1 %v693_v15, %s3278_s0  ;;  %948 = vmatprep.subr.bf16.mxu1 %v2479_v42  ;;  %v1174_v42 = vld [vmem:[%s3238_s9] sm:$0xff]  ;;  %s3184_s20 = scalar_lea.hbm %s3282_s21, %s2228_s28  ;;  %p2557_p11 = scmp.ne.s32.totalorder %s3179_s3, %s2556_s2 }
  0x2d   : > { %2296 = vmatpush3.bf16.msra.mxu0 %v2461_v13  ;;  %v862_v13 = vlaneseq  ;;  %s2560_s29 = sshll.u32 %s2623_s1, 4  ;;  %s2561_s29 = int_to_ptr.vmem [resolvable:$false] %s2560_s29 }
  0x2e   : > { %2297 = vmatprep.subr.bf16.mxu0 %v2462_v18  ;;  %p2558_p12 = pnand %p2557_p11, %p2768_p5  ;;  %s2562_s5 = scalar_lea.vmem %s2561_s29, 512 }
  0x2f   : > { %949 = vmatpush1.bf16.msra.mxu1 %v2481_v43  ;;  %v863_v14 = vshrl.u32 %v862_v13, 7  ;;  %v1175_v43 = vld [vmem:[%s3238_s9 + $0x8] sm:$0xff]  ;;  %v1186_v13 = vld [vmem:[%s3238_s9 + $0x60] sm:$0xff]  ;;  %p2563_p0 = scmp.lt.s32.totalorder %s3179_s3, %s2561_s29  ;;  %p2564_p1 = scmp.lt.s32.totalorder %s2562_s5, %s2556_s2 }
  0x30   : > { %p2559_p13 = pneg %p2558_p12 }
  0x31   : > { %2298 = vmatpush3.bf16.msra.mxu0 %v2462_v18  ;;  %v864_v15 = vsub.s32 0, %v863_v14  ;;  %v868_v17 = vsub.s32 1, %v863_v14  ;;  %v1187_v14 = vld [vmem:[%s3238_s9 + $0x68] sm:$0xff]  ;;  %p2565_p2 = por %p2564_p1, %p2563_p0 }
  0x32   : > { %2299 = vmatprep.subr.bf16.mxu0 %v2463_v22 }
  0x33   : > { %v865_v18 = vrot.slane %v860_v16, %v864_v15  ;;  %v869_v20 = vrot.slane %v860_v16, %v868_v17  ;;  %v2407_v15 = vpack.c.bf16 %v1187_v14, %v1186_v13  ;;  %v1188_v16 = vld [vmem:[%s3238_s9 + $0x70] sm:$0xff]  ;;  %v1189_v17 = vld [vmem:[%s3238_s9 + $0x78] sm:$0xff]  ;;  %v2533_v13 = vld [vmem:[%s3241_s12 + $0x48] sm:$0xff]   ;;  %p2566_p3 = pnand %p2565_p2, %p2559_p13 }
  0x35   : > { %2300 = vmatpush3.bf16.msra.mxu0 %v2463_v22 }
  0x36   : > { %1097 = vmatprep.subr.bf16.mxu0 %v2622_v44 }
  0x99   : > { %v697_v29 = vpop.permute.xlu0 %696 }
  0x9a   : > { %v709_v30 = vsel %vm706_vm0, %v680_v26, %v697_v29  ;;  %v703_v31 = vpop.permute.xlu1 %702 }
  0x9b   : > { %v2833_v33 = vsel %vm713_vm1, %v709_v30, %v703_v31 }
  0x9c   : > { %2301 = vmatprep.mubr.msk.bf16.mxu0 %vm766_vm2, %v2833_v33 }
  0x9d   : > { %v699_v34 = vpop.permute.xlu0 %698 }
  0x9e   : > { %v712_v35 = vsel %vm706_vm0, %v681_v32, %v699_v34  ;;  %v705_v36 = vpop.permute.xlu1 %704 }
  0x9f   : > { %v2839_v37 = vsel %vm713_vm1, %v712_v35, %v705_v36 }
  0xa0   : > { %2302 = vmatmul.mubr.msk.bf16.vlgmr.msra.gmra.mrb[0].mxu0 %vm766_vm2, %v2839_v37 }
  0xa1   : > { %1098 = vmatpush1.bf16.msra.mxu0 %v2482_v45  ;;  %v1176_v45 = vld [vmem:[%s3238_s9 + $0x10] sm:$0xff] }
  0xa2   : > { %1099 = vmatprep.subr.bf16.mxu0 %v2622_v44 }
  0xa5   : > { %1100 = vmatpush1.bf16.msra.mxu0 %v2483_v46  ;;  %v2383_v46 = vpack.c.bf16 %v1175_v43, %v1174_v42  ;;  %v2496_v42 = vld [vmem:[%s3240_s11 + $0x4] ss:$8 sps:$4 sm:$0xff]  }
  0xa6   : > { %1101 = vmatprep.subr.bf16.mxu0 %v2622_v44 }
  0xa7   : > { %2384 = vmatprep.subr.bf16.mxu1 %v2383_v46 }
  0xa9   : > { %1102 = vmatpush1.bf16.msra.mxu0 %v2484_v47  ;;  %v1177_v47 = vld [vmem:[%s3238_s9 + $0x18] sm:$0xff] }
  0xaa   : > { %1103 = vmatprep.subr.bf16.mxu0 %v2622_v44 }
  0xad   : > { %1104 = vmatpush1.bf16.msra.mxu0 %v2485_v48  ;;  %v2387_v48 = vpack.c.bf16 %v1177_v47, %v1176_v45 }
  0xae   : > { %1105 = vmatprep.subr.bf16.mxu0 %v2622_v44 }
  0xb1   : > { %1106 = vmatpush1.bf16.msra.mxu0 %v2486_v49  ;;  %v1178_v49 = vld [vmem:[%s3238_s9 + $0x20] sm:$0xff] }
  0xb2   : > { %1107 = vmatprep.subr.bf16.mxu0 %v2622_v44 }
  0xb5   : > { %1108 = vmatpush1.bf16.msra.mxu0 %v2487_v50  ;;  %v1179_v50 = vld [vmem:[%s3238_s9 + $0x28] sm:$0xff] }
  0xb6   : > { %1109 = vmatprep.subr.bf16.mxu0 %v2622_v44 }
  0xb9   : > { %1110 = vmatpush1.bf16.msra.mxu0 %v2488_v51  ;;  %v2391_v51 = vpack.c.bf16 %v1179_v50, %v1178_v49  ;;  %v2499_v50 = vld [vmem:[%s3240_s11 + $0x14] ss:$8 sps:$4 sm:$0xff]  }
  0xba   : > { %1111 = vmatprep.subr.bf16.mxu0 %v2622_v44 }
  0xbd   : > { %1112 = vmatpush1.bf16.msra.mxu0 %v2489_v52  ;;  %v1180_v52 = vld [vmem:[%s3238_s9 + $0x30] sm:$0xff] }
  0xbe   : > { %1113 = vmatprep.subr.bf16.mxu0 %v2622_v44 }
  0xc1   : > { %1114 = vmatpush1.bf16.msra.mxu0 %v2490_v53  ;;  %v1181_v53 = vld [vmem:[%s3238_s9 + $0x38] sm:$0xff] }
  0xc2   : > { %1115 = vmatprep.subr.bf16.mxu0 %v2622_v44 }
  0xc5   : > { %1116 = vmatpush1.bf16.msra.mxu0 %v2491_v54  ;;  %v2395_v54 = vpack.c.bf16 %v1181_v53, %v1180_v52  ;;  %v2497_v52 = vld [vmem:[%s3240_s11 + $0x10] ss:$8 sps:$4 sm:$0xff]   ;;  %v2502_v53 = vld [vmem:[%s3240_s11 + $0x24] ss:$8 sps:$4 sm:$0xff]  }
  0xc6   : > { %1117 = vmatprep.subr.bf16.mxu0 %v2622_v44 }
  0xc9   : > { %1118 = vmatpush1.bf16.msra.mxu0 %v2492_v11  ;;  %v1185_v11 = vld [vmem:[%s3238_s9 + $0x58] sm:$0xff] }
  0xca   : > { %1119 = vmatprep.subr.bf16.mxu0 %v2622_v44 }
  0xcd   : > { %1120 = vmatpush1.bf16.msra.mxu0 %v2493_v12 }
  0xce   : > { %1744 = vmatprep.subr.bf16.mxu0 %v2622_v44 }
 0x173   : > { %v2303_v56 = vpop.f32.mrb[0].mxu0 }
 0x174   : > { %v829_v58 = vmul.f32 %v2303_v56, %v2130_v55  ;;  %v805_v59 = vpop.f32.mrb[1].mxu0 }
 0x175   : > { %v827_v60 = vmul.f32 %v2130_v55, %v805_v59  ;;  %v2304_v61 = vpop.f32.mrb[2].mxu0 }
 0x176   : > { %v840_v62 = vadd.f32 %v2131_v57, %v829_v58  ;;  %v830_v63 = vmul.f32 %v2304_v61, %v2130_v55  ;;  %v808_v0 = vpop.f32.mrb[3].mxu0 }
 0x177   : > { %v838_v1 = vadd.f32 %v2131_v57, %v827_v60  ;;  %v828_v2 = vmul.f32 %v2130_v55, %v808_v0 }
 0x178   : > { %v841_v3 = vadd.f32 %v2131_v57, %v830_v63  ;;  %v844_v5 = vmax.f32 %v840_v62, 0.0 }
 0x179   : > { %v839_v4 = vadd.f32 %v2131_v57, %v828_v2  ;;  %v842_v7 = vmax.f32 %v838_v1, 0.0 }
 0x17a   : > { %v845_v6 = vmax.f32 %v841_v3, 0.0 }
 0x17b   : > { %v843_v8 = vmax.f32 %v839_v4, 0.0 }
 0x17c   : > { %v847_v9 = vpack.c.bf16 %v845_v6, %v844_v5 }
 0x17d   : > { %v846_v10 = vpack.c.bf16 %v843_v8, %v842_v7  ;;  %v1182_v7 = vld [vmem:[%s3238_s9 + $0x40] sm:$0xff]  ;;  %v1183_v8 = vld [vmem:[%s3238_s9 + $0x48] sm:$0xff] }
 0x17f   : > { %2144 = vmatmul.mubr.msk.bf16.vlgmr.msra.gmra.mrb[0].mxu1 %vm766_vm2, %v846_v10  ;;  %v1184_v10 = vld [vmem:[%s3238_s9 + $0x50] sm:$0xff] }
 0x180   : > { %980 = vmatprep.mubr.bf16.mxu1 %v2622_v44  ;;  %2386 = vmatpush3.bf16.msra.mxu1 %v2383_v46  ;;  %v2403_v12 = vpack.c.bf16 %v1185_v11, %v1184_v10  ;;  %v2530_v10 = vld [vmem:[%s3241_s12 + $0x30] sm:$0xff]   ;;  %v2531_v11 = vld [vmem:[%s3241_s12 + $0x38] sm:$0xff]  }
 0x181   : > { %2388 = vmatprep.subr.bf16.mxu1 %v2387_v48 }
 0x184   : > { %2390 = vmatpush3.bf16.msra.mxu1 %v2387_v48  ;;  %v2494_v48 = vld [vmem:[%s3240_s11] ss:$8 sps:$4 sm:$0xff]  }
 0x185   : > { %2392 = vmatprep.subr.bf16.mxu1 %v2391_v51 }
 0x187   : > { %2145 = vmatmul.mubr.msk.bf16.gmra.mrb[4].mxu1 %vm766_vm2, %v847_v9  ;;  %v2399_v9 = vpack.c.bf16 %v1183_v8, %v1182_v7  ;;  %v2527_v7 = vld [vmem:[%s3241_s12 + $0x18] sm:$0xff]   ;;  %v2528_v8 = vld [vmem:[%s3241_s12 + $0x20] sm:$0xff]  }
 0x188   : > { %2394 = vmatpush3.bf16.msra.mxu1 %v2391_v51 }
 0x189   : > { %2396 = vmatprep.subr.bf16.mxu1 %v2395_v54 }
 0x18c   : > { %2398 = vmatpush3.bf16.msra.mxu1 %v2395_v54  ;;  %v2500_v54 = vld [vmem:[%s3240_s11 + $0x20] ss:$8 sps:$4 sm:$0xff]  }
 0x18d   : > { %2400 = vmatprep.subr.bf16.mxu1 %v2399_v9 }
 0x190   : > { %2402 = vmatpush3.bf16.msra.mxu1 %v2399_v9  ;;  %v2529_v9 = vld [vmem:[%s3241_s12 + $0x28] sm:$0xff]  }
 0x191   : > { %2404 = vmatprep.subr.bf16.mxu1 %v2403_v12 }
 0x194   : > { %2406 = vmatpush3.bf16.msra.mxu1 %v2403_v12  ;;  %v2532_v12 = vld [vmem:[%s3241_s12 + $0x40] sm:$0xff]  }
 0x195   : > { %2408 = vmatprep.subr.bf16.mxu1 %v2407_v15 }
 0x198   : > { %2410 = vmatpush3.bf16.msra.mxu1 %v2407_v15 }
 0x252   : > { %v972_v19 = vpop.f32.mrb[0].mxu1 }
 0x253   : > { %v974_v21 = vpop.f32.mrb[1].mxu1  ;;  %v973_v23 = vadd.f32 %v972_v19, %v865_v18 }
 0x254   : > { %v976_v22 = vpop.f32.mrb[2].mxu1  ;;  %v975_v26 = vadd.f32 %v974_v21, %v869_v20 }
 0x255   : > { %v977_v24 = vadd.f32 %v976_v22, %v865_v18  ;;  %v978_v25 = vpop.f32.mrb[3].mxu1 }
 0x256   : > { %v979_v27 = vadd.f32 %v978_v25, %v869_v20 }
 0x257   : > { %v2923_v28 = vpack.c.bf16 %v977_v24, %v973_v23 }
 0x258   : > { %v2925_v29 = vpack.c.bf16 %v979_v27, %v975_v26 }
 0x25a   : > { %v982_v30 = vpop.f32.mrb[4].mxu1  ;;  %2158 = vmatprep.mubr.msk.bf16.mxu0 %vm713_vm1, %v2925_v29 }
 0x25b   : > { %v984_v31 = vpop.f32.mrb[5].mxu1  ;;  %1130 = vmatmul.mubr.bf16.vlgmr.msra.gmra.mrb[4].mxu0 %v2923_v28  ;;  %v983_v34 = vadd.f32 %v982_v30, %v865_v18 }
 0x25c   : > { %v986_v32 = vpop.f32.mrb[6].mxu1  ;;  %v985_v38 = vadd.f32 %v984_v31, %v869_v20 }
 0x25d   : > { %v987_v35 = vadd.f32 %v986_v32, %v865_v18  ;;  %v988_v36 = vpop.f32.mrb[7].mxu1  ;;  %v2411_v18 = vpack.c.bf16 %v1189_v17, %v1188_v16 }
 0x25e   : > { %v989_v39 = vadd.f32 %v988_v36, %v869_v20 }
 0x25f   : > { %v2930_v40 = vpack.c.bf16 %v987_v35, %v983_v34  ;;  %2412 = vmatprep.subr.bf16.mxu1 %v2411_v18 }
 0x260   : > { %v2932_v41 = vpack.c.bf16 %v989_v39, %v985_v38  ;;  %2414 = vmatpush3.bf16.msra.mxu1 %v2411_v18  ;;  %v1279_v39 = vld [vmem:[%s3239_s10] sm:$0x3] }
 0x261   : > { %2343 = vmatprep.subr.msk.mxu1 %vm1293_vm3, %v1279_v39 }
 0x262   : > { %2159 = vmatprep.mubr.msk.bf16.mxu0 %vm713_vm1, %v2932_v41 }
 0x263   : > { %1138 = vmatmul.mubr.bf16.gmra.mrb[8].mxu0 %v2930_v40 }
 0x32e   : > { %v1131_v55 = vpop.f32.mrb[4].mxu0 }
 0x32f   : > { %v1146_v56 = vmul.f32 0.2, %v1131_v55  ;;  %v1133_v57 = vpop.f32.mrb[5].mxu0 }
 0x330   : > { %v1134_v58 = vpop.f32.mrb[6].mxu0 }
 0x331   : > { %v1147_v59 = vmul.f32 0.2, %v1134_v58  ;;  %v1136_v60 = vpop.f32.mrb[7].mxu0  ;;  %v1150_v61 = vmax.f32 %v1131_v55, %v1146_v56  ;;  %v2505_v55 = vld [vmem:[%s3240_s11 + $0x34] ss:$8 sps:$4 sm:$0xff]  }
 0x332   : > { %v2506_v60 = vld [vmem:[%s3240_s11 + $0x40] ss:$8 sps:$4 sm:$0xff]  }
 0x333   : > { %1154 = vmax.xlane.f32.xlu0 %v1150_v61  ;;  %v1151_v62 = vmax.f32 %v1134_v58, %v1147_v59  ;;  %v2503_v58 = vld [vmem:[%s3240_s11 + $0x30] ss:$8 sps:$4 sm:$0xff]   ;;  %v2508_v59 = vld [vmem:[%s3240_s11 + $0x44] ss:$8 sps:$4 sm:$0xff]  }
 0x335   : > { %1156 = vmax.xlane.f32.xlu1 %v1151_v62 }
 0x336   : > { %v1139_v63 = vpop.f32.mrb[8].mxu0 }
 0x337   : > { %v1148_v0 = vmul.f32 0.2, %v1139_v63  ;;  %v1141_v1 = vpop.f32.mrb[9].mxu0 }
 0x338   : > { %v1142_v2 = vpop.f32.mrb[10].mxu0  ;;  %v2517_v1 = vld [vmem:[%s3240_s11 + $0x74] ss:$8 sps:$4 sm:$0xff]  }
 0x339   : > { %v1149_v3 = vmul.f32 0.2, %v1142_v2  ;;  %v1144_v4 = vpop.f32.mrb[11].mxu0  ;;  %v1152_v5 = vmax.f32 %v1139_v63, %v1148_v0  ;;  %v2514_v63 = vld [vmem:[%s3240_s11 + $0x64] ss:$8 sps:$4 sm:$0xff]  }
 0x33a   : > { %v2512_v0 = vld [vmem:[%s3240_s11 + $0x60] ss:$8 sps:$4 sm:$0xff]  }
 0x33b   : > { %1158 = vmax.xlane.f32.xlu0 %v1152_v5  ;;  %v1153_v6 = vmax.f32 %v1142_v2, %v1149_v3  ;;  %v2515_v2 = vld [vmem:[%s3240_s11 + $0x70] ss:$8 sps:$4 sm:$0xff]   ;;  %v2518_v3 = vld [vmem:[%s3242_s13] sm:$0xff]  }
 0x33c   : > { %v2524_v4 = vld [vmem:[%s3241_s12] sm:$0xff]  }
 0x33d   : > { %1745 = vmatpush1.bf16.msra.mxu0 %v2524_v4 }
 0x33e   : > { %1746 = vmatprep.subr.bf16.mxu0 %v2622_v44 }
 0x33f   : > { %1160 = vmax.xlane.f32.xlu0 %v1153_v6 }
 0x3c0   : > { %v1155_v19 = vpop.xlane.xlu0 %1154 }
 0x3c1   : > { %v1162_v20 = vsub.f32 %v1150_v61, %v1155_v19  ;;  %v2511_v61 = vld [vmem:[%s3240_s11 + $0x54] ss:$8 sps:$4 sm:$0xff]   ;;  %v2519_v19 = vld [vmem:[%s3242_s13 + $0x8] sm:$0xff]  }
 0x3c2   : > { %v1157_v21 = vpop.xlane.xlu1 %1156 }
 0x3c3   : > { %v1166_v22 = vmul.f32 1.442695, %v1162_v20  ;;  %v1163_v23 = vsub.f32 %v1151_v62, %v1157_v21  ;;  %v2509_v62 = vld [vmem:[%s3240_s11 + $0x50] ss:$8 sps:$4 sm:$0xff]  }
 0x3c4   : > { %v2520_v20 = vld [vmem:[%s3242_s13 + $0x10] sm:$0xff]  }
 0x3c5   : > { %2540 = vpow2.f32 %v1166_v22  ;;  %v1168_v24 = vmul.f32 1.442695, %v1163_v23 }
 0x3c7   : > { %2542 = vpow2.f32 %v1168_v24 }
 0x3c8   : > { %v1159_v25 = vpop.xlane.xlu0 %1158 }
 0x3c9   : > { %v1164_v26 = vsub.f32 %v1152_v5, %v1159_v25  ;;  %v2525_v5 = vld [vmem:[%s3241_s12 + $0x8] sm:$0xff]   ;;  %v2521_v25 = vld [vmem:[%s3242_s13 + $0x18] sm:$0xff]  }
 0x3ca   : > { %1747 = vmatpush1.bf16.msra.mxu0 %v2525_v5 }
 0x3cb   : > { %v1170_v27 = vmul.f32 1.442695, %v1164_v26  ;;  %1748 = vmatprep.subr.bf16.mxu0 %v2622_v44 }
 0x3cc   : > { %v1161_v30 = vpop.xlane.xlu0 %1160 }
 0x3cd   : > { %2544 = vpow2.f32 %v1170_v27  ;;  %v1165_v31 = vsub.f32 %v1153_v6, %v1161_v30  ;;  %v2526_v6 = vld [vmem:[%s3241_s12 + $0x10] sm:$0xff]   ;;  %v2522_v27 = vld [vmem:[%s3242_s13 + $0x20] sm:$0xff]   ;;  %v2523_v30 = vld [vmem:[%s3242_s13 + $0x28] sm:$0xff]  }
 0x3ce   : > { %1749 = vmatpush1.bf16.msra.mxu0 %v2526_v6 }
 0x3cf   : > { %v2985_v32 = vpop.eup %2540  ;;  %v1172_v34 = vmul.f32 1.442695, %v1165_v31  ;;  %1750 = vmatprep.subr.bf16.mxu0 %v2622_v44  ;;  %v2534_v31 = vld [vmem:[%s3241_s12 + $0x50] sm:$0xff]  }
 0x3d0   : > { %2337 = vmatprep.mubr.f32.mxu1 %v2985_v32 }
 0x3d1   : > { %v2988_v35 = vpop.eup %2542  ;;  %2546 = vpow2.f32 %v1172_v34 }
 0x3d2   : > { %2338 = vmatmul.mubr.f32.vlgmr.msra.gmra.mrb[8].mxu1 %v2988_v35  ;;  %1751 = vmatpush1.bf16.msra.mxu0 %v2527_v7 }
 0x3d3   : > { %2344 = vmatpush3.msk.msra.mxu1 %vm1293_vm3, %v1279_v39  ;;  %1752 = vmatprep.subr.bf16.mxu0 %v2622_v44 }
 0x3d4   : > { %1484 = vmatprep.subr.bf16.mxu1 %v2496_v42 }
 0x3d6   : > { %1753 = vmatpush1.bf16.msra.mxu0 %v2528_v8 }
 0x3d7   : > { %v2991_v36 = vpop.eup %2544  ;;  %1754 = vmatprep.subr.bf16.mxu0 %v2622_v44 }
 0x3d8   : > { %2340 = vmatprep.mubr.f32.mxu1 %v2991_v36 }
 0x3da   : > { %1755 = vmatpush1.bf16.msra.mxu0 %v2529_v9 }
 0x3db   : > { %v2994_v38 = vpop.eup %2546  ;;  %1756 = vmatprep.subr.bf16.mxu0 %v2622_v44 }
 0x3dc   : > { %2341 = vmatmul.mubr.f32.gmra.mrb[10].mxu1 %v2994_v38 }
 0x3de   : > { %1757 = vmatpush1.bf16.msra.mxu0 %v2530_v10 }
 0x3df   : > { %1758 = vmatprep.subr.bf16.mxu0 %v2622_v44 }
 0x3e2   : > { %1759 = vmatpush1.bf16.msra.mxu0 %v2531_v11 }
 0x3e3   : > { %1760 = vmatprep.subr.bf16.mxu0 %v2622_v44 }
 0x3e6   : > { %1761 = vmatpush1.bf16.msra.mxu0 %v2532_v12  ;;  %v2538_v12 = vld [vmem:[%s3247_s18] sm:$0xff]  }
 0x3e7   : > { %1762 = vmatprep.subr.bf16.mxu0 %v2622_v44 }
 0x3ea   : > { %1763 = vmatpush1.bf16.msra.mxu0 %v2533_v13  ;;  %v2539_v13 = vld [vmem:[%s3247_s18 + $0x8] sm:$0xff]  }
 0x3eb   : > { %1764 = vmatprep.subr.bf16.mxu0 %v2622_v44 }
 0x3ee   : > { %1765 = vmatpush1.bf16.msra.mxu0 %v2534_v31 }
 0x3ef   : > { %1766 = vmatprep.subr.bf16.mxu0 %v2622_v44 }
 0x4a5   : > { %v2339_v43 = vpop.f32.mrb[8].mxu1 }
 0x4a6   : > { %v1256_v45 = vpop.f32.mrb[9].mxu1 }
 0x4a7   : > { %2548 = vrcp.f32 %v1256_v45 }
 0x4a8   : > { %2550 = vrcp.f32 %v2339_v43 }
 0x4af   : > { %v2342_v46 = vpop.f32.mrb[10].mxu1 }
 0x4b0   : > { %v1266_v47 = vpop.f32.mrb[11].mxu1 }
 0x4b1   : > { %v2549_v49 = vpop.eup %2548  ;;  %2552 = vrcp.f32 %v1266_v47 }
 0x4b2   : > { %v2551_v51 = vpop.eup %2550  ;;  %2554 = vrcp.f32 %v2342_v46  ;;  %2345 = vmatprep.mubr.msk.f32.mxu1 %vm1280_vm4, %v2549_v49 }
 0x4b3   : > { %2346 = vmatmul.mubr.msk.f32.vlgmr.msra.gmra.mrb[12].mxu1 %vm1280_vm4, %v2551_v51 }
 0x4b4   : > { %1485 = vmatpush1.bf16.msra.mxu1 %v2494_v48 }
 0x4b5   : > { %1486 = vmatprep.subr.bf16.mxu1 %v2499_v50 }
 0x4b8   : > { %1487 = vmatpush1.bf16.msra.mxu1 %v2497_v52 }
 0x4b9   : > { %1488 = vmatprep.subr.bf16.mxu1 %v2502_v53  ;;  %v2536_v53 = vld [vmem:[%s3244_s15] sm:$0xff]  }
 0x4bb   : > { %v2553_v56 = vpop.eup %2552 }
 0x4bc   : > { %v2555_v57 = vpop.eup %2554  ;;  %2348 = vmatprep.mubr.msk.f32.mxu1 %vm1280_vm4, %v2553_v56  ;;  %1489 = vmatpush1.bf16.msra.mxu1 %v2500_v54  ;;  %v2537_v54 = vld [vmem:[%s3244_s15 + $0x8] sm:$0xff]  }
 0x4bd   : > { %2349 = vmatmul.mubr.msk.f32.gmra.mrb[14].mxu1 %vm1280_vm4, %v2555_v57  ;;  %1490 = vmatprep.subr.bf16.mxu1 %v2505_v55 }
 0x4be   : > { %1516 = vmatprep.mubr.bf16.mxu1 %v2622_v44 }
 0x4c0   : > { %1491 = vmatpush1.bf16.msra.mxu1 %v2503_v58 }
 0x4c1   : > { %1492 = vmatprep.subr.bf16.mxu1 %v2508_v59 }
 0x4c4   : > { %1493 = vmatpush1.bf16.msra.mxu1 %v2506_v60 }
 0x4c5   : > { %1494 = vmatprep.subr.bf16.mxu1 %v2511_v61 }
 0x4c8   : > { %1495 = vmatpush1.bf16.msra.mxu1 %v2509_v62 }
 0x4c9   : > { %1496 = vmatprep.subr.bf16.mxu1 %v2514_v63 }
 0x4cc   : > { %1497 = vmatpush1.bf16.msra.mxu1 %v2512_v0 }
 0x4cd   : > { %1498 = vmatprep.subr.bf16.mxu1 %v2517_v1 }
 0x4d0   : > { %1499 = vmatpush1.bf16.msra.mxu1 %v2515_v2 }
 0x4d1   : > { %2351 = vmatprep.subr.bf16.mxu1 %v2518_v3 }
 0x586   : > { %v2347_v14 = vpop.f32.mrb[12].mxu1 }
 0x587   : > { %v3097_v15 = vmul.f32 %v2988_v35, %v2347_v14  ;;  %v1363_v16 = vpop.f32.mrb[13].mxu1  ;;  %v2208_v14 = vld [vmem:[%s3245_s16] ss:$0 sm:$0xff] }
 0x588   : > { %v3100_v17 = vmul.f32 %v2985_v32, %v1363_v16 }
 0x58a   : > { %v1386_v18 = vpack.c.bf16 %v3097_v15, %v3100_v17 }
 0x58c   : > { %1517 = vmatmul.mubr.bf16.vlgmr.msra.gmra.mrb[16].mxu1 %v1386_v18  ;;  %v2209_v18 = vld [vmem:[%s3246_s17] ss:$0 sm:$0xff] }
 0x58d   : > { %2352 = vmatpush3.bf16.msra.mxu1 %v2518_v3  ;;  %1526 = vmatprep.mubr.bf16.mxu1 %v2622_v44 }
 0x58e   : > { %2353 = vmatprep.subr.bf16.mxu1 %v2519_v19 }
 0x590   : > { %v2350_v21 = vpop.f32.mrb[14].mxu1 }
 0x591   : > { %v3112_v22 = vmul.f32 %v2994_v38, %v2350_v21  ;;  %2354 = vmatpush3.bf16.msra.mxu1 %v2519_v19  ;;  %v1373_v23 = vpop.f32.mrb[15].mxu1 }
 0x592   : > { %v3115_v24 = vmul.f32 %v2991_v36, %v1373_v23  ;;  %2355 = vmatprep.subr.bf16.mxu1 %v2520_v20 }
 0x594   : > { %v1387_v26 = vpack.c.bf16 %v3112_v22, %v3115_v24 }
 0x595   : > { %2356 = vmatpush3.bf16.msra.mxu1 %v2520_v20 }
 0x596   : > { %1527 = vmatmul.mubr.bf16.gmra.mrb[20].mxu1 %v1387_v26  ;;  %2357 = vmatprep.subr.bf16.mxu1 %v2521_v25 }
 0x597   : > { %2363 = vmatprep.mubr.msk.bf16.mxu1 %vm766_vm2, %v2833_v33  ;;  %v2535_v33 = vld [vmem:[%s3241_s12 + $0x58] sm:$0xff]  }
 0x598   : > { %1767 = vmatpush1.bf16.msra.mxu0 %v2535_v33 }
 0x599   : > { %2358 = vmatpush3.bf16.msra.mxu1 %v2521_v25 }
 0x59a   : > { %2359 = vmatprep.subr.bf16.mxu1 %v2522_v27 }
 0x59d   : > { %2360 = vmatpush3.bf16.msra.mxu1 %v2522_v27 }
 0x59e   : > { %2361 = vmatprep.subr.bf16.mxu1 %v2523_v30 }
 0x5a1   : > { %2362 = vmatpush3.bf16.msra.mxu1 %v2523_v30 }
 0x5a2   : > { %2367 = vmatprep.subr.bf16.mxu1 %v2536_v53 }
 0x5a4   : > { %2364 = vmatmul.mubr.msk.bf16.vlgmr.msra.gmra.mrb[24].mxu1 %vm766_vm2, %v2839_v37 }
 0x5a5   : > { %2368 = vmatpush3.bf16.msra.mxu1 %v2536_v53 }
 0x5a6   : > { %2369 = vmatprep.subr.bf16.mxu1 %v2537_v54 }
 0x5a9   : > { %2370 = vmatpush3.bf16.msra.mxu1 %v2537_v54 }
 0x5aa   : > { %2375 = vmatprep.subr.bf16.mxu1 %v2538_v12 }
 0x65f   : > { %v1518_v32 = vpop.f32.mrb[16].mxu1 }
 0x660   : > { %v1520_v34 = vpop.f32.mrb[17].mxu1 }
 0x661   : > { %v1522_v35 = vpop.f32.mrb[18].mxu1 }
 0x662   : > { %v1537_v36 = vpack.c.bf16 %v1522_v35, %v1518_v32  ;;  %v1524_v38 = vpop.f32.mrb[19].mxu1 }
 0x663   : > { %v1538_v39 = vpack.c.bf16 %v1524_v38, %v1520_v34 }
 0x664   : > { %v1541_v42 = vmul.bf16 %v1537_v36, %v2923_v28 }
 0x665   : > { %v1542_v37 = vmul.bf16 %v1538_v39, %v2925_v29 }
 0x667   : > { %2201 = vmatprep.mubr.msk.bf16.mxu0 %vm713_vm1, %v1542_v37 }
 0x668   : > { %1777 = vmatmul.mubr.bf16.vlgmr.msra.gmra.mrb[12].mxu0 %v1541_v42  ;;  %v2210_v42 = vld [vmem:[%s3248_s19] ss:$0 sm:$0xff] }
 0x669   : > { %v1528_v43 = vpop.f32.mrb[20].mxu1 }
 0x66a   : > { %v1530_v44 = vpop.f32.mrb[21].mxu1 }
 0x66b   : > { %v1532_v45 = vpop.f32.mrb[22].mxu1 }
 0x66c   : > { %v1539_v46 = vpack.c.bf16 %v1532_v45, %v1528_v43  ;;  %v1534_v47 = vpop.f32.mrb[23].mxu1 }
 0x66d   : > { %v1540_v48 = vpack.c.bf16 %v1534_v47, %v1530_v44 }
 0x66e   : > { %v1543_v50 = vmul.bf16 %v1539_v46, %v2930_v40 }
 0x66f   : > { %v1544_v49 = vmul.bf16 %v1540_v48, %v2932_v41  ;;  %v2203_v41 = vld [vmem:[%s3243_s14] ss:$0 sm:$0xff] }
 0x671   : > { %2202 = vmatprep.mubr.msk.bf16.mxu0 %vm713_vm1, %v1544_v49 }
 0x672   : > { %1785 = vmatmul.mubr.bf16.gmra.mrb[16].mxu0 %v1543_v50 }
 0x677   : > { %v2365_v51 = vpop.f32.mrb[24].mxu1 }
 0x678   : > { %v1651_v29 = vpop.f32.mrb[25].mxu1 }
 0x679   : > { %v2366_v52 = vpop.f32.mrb[26].mxu1 }
 0x67a   : > { %v1654_v28 = vpop.f32.mrb[27].mxu1 }
 0x73b   : > { %v1778_v40 = vpop.f32.mrb[12].mxu0 }
 0x73c   : > { %v1779_v55 = vadd.f32 %v1778_v40, %v1651_v29  ;;  %v1780_v56 = vpop.f32.mrb[13].mxu0 }
 0x73d   : > { %v1781_v57 = vpop.f32.mrb[14].mxu0 }
 0x73e   : > { %v1800_v58 = vadd.f32 %v2203_v41, %v1779_v55  ;;  %v1782_v59 = vadd.f32 %v1781_v57, %v1654_v28  ;;  %v1783_v60 = vpop.f32.mrb[15].mxu0 }
 0x740   : > { %v1801_v61 = vadd.f32 %v2203_v41, %v1782_v59  ;;  %v1804_v62 = vmax.f32 %v1800_v58, 0.0 }
 0x742   : > { %v1805_v63 = vmax.f32 %v1801_v61, 0.0 }
 0x744   : > { %v1808_v0 = vpack.c.bf16 %v1805_v63, %v1804_v62 }
 0x745   : > { %v1786_v1 = vpop.f32.mrb[16].mxu0 }
 0x746   : > { %v1787_v2 = vadd.f32 %v2365_v51, %v1786_v1  ;;  %v1788_v3 = vpop.f32.mrb[17].mxu0  ;;  %2371 = vmatprep.mubr.msk.bf16.mxu1 %vm706_vm0, %v1808_v0 }
 0x747   : > { %v1789_v4 = vpop.f32.mrb[18].mxu0 }
 0x748   : > { %v1802_v5 = vadd.f32 %v2203_v41, %v1787_v2  ;;  %v1790_v6 = vadd.f32 %v2366_v52, %v1789_v4  ;;  %v1791_v7 = vpop.f32.mrb[19].mxu0 }
 0x74a   : > { %v1803_v8 = vadd.f32 %v2203_v41, %v1790_v6  ;;  %v1806_v9 = vmax.f32 %v1802_v5, 0.0 }
 0x74c   : > { %v1807_v10 = vmax.f32 %v1803_v8, 0.0 }
 0x74e   : > { %v1809_v11 = vpack.c.bf16 %v1807_v10, %v1806_v9 }
 0x750   : > { %2372 = vmatmul.mubr.msk.bf16.vlgmr.msra.gmra.mrb[28].mxu1 %vm706_vm0, %v1809_v11 }
 0x751   : > { %2376 = vmatpush3.bf16.msra.mxu1 %v2538_v12 }
 0x752   : > { %2377 = vmatprep.subr.bf16.mxu1 %v2539_v13 }
 0x755   : > { %2378 = vmatpush3.bf16.msra.mxu1 %v2539_v13 }
 0x823   : > { %v2373_v16 = vpop.f32.mrb[28].mxu1 }
 0x824   : > { %v1890_v19 = vmul.f32 %v2373_v16, %v2208_v14  ;;  %v1866_v20 = vpop.f32.mrb[29].mxu1 }
 0x825   : > { %v1888_v21 = vmul.f32 %v2208_v14, %v1866_v20  ;;  %v2374_v23 = vpop.f32.mrb[30].mxu1 }
 0x826   : > { %v1901_v25 = vadd.f32 %v2209_v18, %v1890_v19  ;;  %v1891_v26 = vmul.f32 %v2374_v23, %v2208_v14  ;;  %v1869_v27 = vpop.f32.mrb[31].mxu1 }
 0x827   : > { %v1899_v30 = vadd.f32 %v2209_v18, %v1888_v21  ;;  %v1889_v31 = vmul.f32 %v2208_v14, %v1869_v27 }
 0x828   : > { %v1902_v33 = vadd.f32 %v2209_v18, %v1891_v26  ;;  %v1905_v34 = vmax.f32 %v1901_v25, 0.0 }
 0x829   : > { %v1900_v32 = vadd.f32 %v2209_v18, %v1889_v31  ;;  %v1903_v36 = vmax.f32 %v1899_v30, 0.0 }
 0x82a   : > { %v1906_v35 = vmax.f32 %v1902_v33, 0.0 }
 0x82b   : > { %v1904_v38 = vmax.f32 %v1900_v32, 0.0 }
 0x82c   : > { %v1908_v39 = vpack.c.bf16 %v1906_v35, %v1905_v34 }
 0x82d   : > { %v1907_v37 = vpack.c.bf16 %v1904_v38, %v1903_v36 }
 0x82f   : > { %2379 = vmatprep.mubr.msk.bf16.mxu1 %vm706_vm0, %v1907_v37 }
 0x830   : > { %2380 = vmatmul.mubr.msk.bf16.vlgmr.msra.gmra.mrb[32].mxu1 %vm706_vm0, %v1908_v39 }
 0x903   : > { %v2381_v43 = vpop.f32.mrb[32].mxu1 }
 0x904   : > { %v1981_v44 = vadd.f32 %v2381_v43, %v2210_v42  ;;  %v1972_v45 = vpop.f32.mrb[33].mxu1 }
 0x905   : > { %v1973_v46 = vadd.f32 %v2210_v42, %v1972_v45  ;;  %v2382_v47 = vpop.f32.mrb[34].mxu1 }
 0x906   : > { %v1984_v48 = vadd.f32 %v2382_v47, %v2210_v42  ;;  %v1975_v49 = vpop.f32.mrb[35].mxu1  ;;  %v1989_v51 = vadd.f32 %v1981_v44, %v3115_v24 }
 0x907   : > { %v1976_v50 = vadd.f32 %v2210_v42, %v1975_v49  ;;  %v1987_v52 = vadd.f32 %v1973_v46, %v3100_v17 }
 0x908   : > { %v1990_v29 = vadd.f32 %v1984_v48, %v3112_v22 }
 0x909   : > { %v1988_v28 = vadd.f32 %v1976_v50, %v3097_v15 }
 0x90a   : > { %v2237_v53 = vpack.c.bf16 %v1990_v29, %v1989_v51 }
 0x90b   : > { %v2232_v54 = vpack.c.bf16 %v1988_v28, %v1987_v52 }
 0x90c   : > { %2239 = vst [vmem:[%s655_s23 + $0x8] sm:$0xff] %v2237_v53  }
 0x90d   : > { %2233 = vst [vmem:[%s655_s23] sm:$0xff] %v2232_v54  }
 0x90e   : > { %2569 = shalt.err (!%p2566_p3)
}
 0x90f   : > { %s2570_s26 = scalar_lea.hbm %s3184_s20, 256  ;;  %s2574_s24 = scalar_lea.hbm %s3282_s21, 512 }
 0x910   : > { %p2571_p4 = scmp.ne.s32.totalorder %s3184_s20, %s2570_s26  ;;  %p2575_p9 = scmp.lt.u32.totalorder %s3184_s20, %s3282_s21 }
 0x911   : > { %p2576_p10 = scmp.lt.u32.totalorder %s2574_s24, %s2570_s26  ;;  %p2578_p12 = scmp.lt.u32.totalorder %s2570_s26, %s3184_s20 }
 0x912   : > { %p2572_p7 = pnand %p2571_p4, %p2768_p5 }
 0x913   : > { %p2577_p11 = por %p2576_p10, %p2575_p9 }
 0x914   : > { %p2573_p8 = pneg %p2572_p7 }
 0x915   : > { %p2579_p13 = por %p2578_p12, %p2577_p11 }
 0x917   : > { %p2580_p0 = pnand %p2579_p13, %p2573_p8 }
 0x919   : > { %2583 = shalt.err (!%p2580_p0)
}
 0x91a   : > { %s2624_s5 = smov 4  }
 0x91b   : > { %2415 = dma.vmem_to_hbm [thread:$0]  (%p2768_p5), %s3179_s3, 256, %s3184_s20, %s3186_s27, %s3278_s0, %s3278_s0, %s2624_s5  }
 0x91c PF: > { %s3283_s2 = sld [smem:[#allocation7_spill]]  ;;  %s3284_s29 = sld [smem:[#allocation5_spill]] }
 0x922   : > { %p2421_p1 = scmp.ge.s32.totalorder %s3283_s2, 2  ;;  %s2040_s28 = sand.u32 1, %s3284_s29  }
 0x923   : > { %s2041_s26 = scalar_lea.sflag [#allocation3], %s2040_s28 }
 0x924   : > { %p2418_p2 = pnand %p2421_p1, %p2772_p6 }
 0x926   : > { %2601 = dma.done.wait (!%p2418_p2), %s2041_s26, 256  }
 0x927   : > { %2603 = vsyncadd (!%p2418_p2), %s2041_s26, 4294967040  ;;  %s3286_s24 = sld [smem:[#allocation8_spill]]  ;;  %s3287_s4 = sld [smem:[#allocation6_spill]] }
 0x928   : > { %s3288_s23 = sld [smem:[#allocation9_spill]]  ;;  %s3289_s1 = smov %s2610_s22 }
 0x92d   : > { %p30_p3 = scmp.ge.s32.totalorder %s3286_s24, 4   ;;  %s3290_s22 = smov %s3287_s4 }
 0x92f   :  { %32 = sbr.rel (!%p30_p3) target bundleno = 11 (0xb), region = 141 }
 0x936   :  { %2046 = vsyncpa [#allocation3], 1 }
 0x937   :  { %2048 = vsyncpa [#allocation3 + $0x1], 1 }

</bundles_post_ra>
